<compile_context>
chip_gen: v7x
topology: tpu7x:2x2x1
jax: 0.10.0
libtpu: 0.0.40
codegen_flags: <defaults>
</compile_context>

<pallas_src>
import jax
import jax.numpy as jnp
from jax.experimental import pallas as pl
from jax.experimental.pallas import tpu as pltpu

EPS = 1e-5
_VMEM_LIMIT = 32 * 1024 * 1024   # safe scoped-VMEM ceiling on v5e/v6e/v7x


def _round_up(x, m):
    return (x + m - 1) // m * m


def _pick_tile(dim, max_tile, align):
    """Largest `align`-aligned tile <= max_tile whose total padding is < align."""
    dim_a = _round_up(dim, align)
    if dim_a <= max_tile:
        return dim_a
    n = dim_a // align
    for d in range(max_tile // align, 0, -1):
        if n % d == 0:
            return d * align
    return align


# ----------------------------------------------------------------------------
# Kernel 1: stand-in backbone = tiled bf16 GEMM (f32 accumulation on the MXU)
# ----------------------------------------------------------------------------
def _backbone_kernel_1k(x_ref, w_ref, b_ref, o_ref):
    # Single K step: no accumulator scratch, no init/finalize phases.
    acc = jnp.dot(x_ref[...].astype(jnp.bfloat16), w_ref[...],
                  preferred_element_type=jnp.float32)
    o_ref[...] = (acc + b_ref[...]).astype(o_ref.dtype)


def _backbone_kernel_mk(x_ref, w_ref, b_ref, o_ref):
    # Multi-K: accumulate directly into the (f32) output block — no scratch.
    k = pl.program_id(2)

    @pl.when(k == 0)
    def _():
        o_ref[...] = jnp.zeros_like(o_ref)

    o_ref[...] += jnp.dot(x_ref[...].astype(jnp.bfloat16), w_ref[...],
                          preferred_element_type=jnp.float32)

    @pl.when(k == pl.num_programs(2) - 1)
    def _():
        o_ref[...] += b_ref[...]


def backbone_features(x, w, b, *, tm=512, tn=512, tk=1024,
                      out_dtype=jnp.bfloat16):
    """(M, K) @ (K, N) bf16 GEMM + bias -> (M, N) `out_dtype`, tiled Pallas."""
    M, K = x.shape
    N = w.shape[1]

    tm_ = _pick_tile(M, tm, 8)
    tn_ = _pick_tile(N, tn, 128)
    k_aligned = _round_up(K, 128)
    single_k = k_aligned <= 2048
    tk_ = k_aligned if single_k else _pick_tile(K, tk, 128)

    Mp = _round_up(M, tm_)
    Np = _round_up(N, tn_)
    Kp = _round_up(K, tk_)

    # Pre-cast activations to bf16 only when the weight column-tiling would
    # otherwise re-read the f32 activations many times; at a single column
    # tile the cast is folded into the kernel's tile load instead.
    if Np // tn_ >= 4:
        x = x.astype(jnp.bfloat16)

    x_p = x if (Mp == M and Kp == K) else jnp.pad(x, ((0, Mp - M), (0, Kp - K)))
    w_p = w if (Kp == K and Np == N) else jnp.pad(w, ((0, Kp - K), (0, Np - N)))
    b_p = b if Np == N else jnp.pad(b, ((0, 0), (0, Np - N)))

    cost = pl.CostEstimate(
        flops=2 * Mp * Kp * Np,
        transcendentals=0,
        bytes_accessed=(Mp * Kp * x_p.dtype.itemsize
                        + Kp * Np * w_p.dtype.itemsize
                        + Mp * Np * jnp.dtype(out_dtype).itemsize),
    )

    if single_k:
        out = pl.pallas_call(
            _backbone_kernel_1k,
            out_shape=jax.ShapeDtypeStruct((Mp, Np), out_dtype),
            grid_spec=pltpu.PrefetchScalarGridSpec(
                num_scalar_prefetch=0,
                grid=(Mp // tm_, Np // tn_),
                in_specs=[
                    pl.BlockSpec((tm_, Kp), lambda i, j: (i, 0)),
                    pl.BlockSpec((Kp, tn_), lambda i, j: (0, j)),
                    pl.BlockSpec((1, tn_), lambda i, j: (0, j)),
                ],
                out_specs=pl.BlockSpec((tm_, tn_), lambda i, j: (i, j)),
            ),
            compiler_params=pltpu.CompilerParams(
                dimension_semantics=("parallel", "parallel"),
                vmem_limit_bytes=_VMEM_LIMIT,
            ),
            cost_estimate=cost,
        )(x_p, w_p, b_p)
        return out[:M, :N]

    # Large-K path: f32 output block doubles as the accumulator.
    out = pl.pallas_call(
        _backbone_kernel_mk,
        out_shape=jax.ShapeDtypeStruct((Mp, Np), jnp.float32),
        grid_spec=pltpu.PrefetchScalarGridSpec(
            num_scalar_prefetch=0,
            grid=(Mp // tm_, Np // tn_, Kp // tk_),
            in_specs=[
                pl.BlockSpec((tm_, tk_), lambda i, j, k: (i, k)),
                pl.BlockSpec((tk_, tn_), lambda i, j, k: (k, j)),
                pl.BlockSpec((1, tn_), lambda i, j, k: (0, j)),
            ],
            out_specs=pl.BlockSpec((tm_, tn_), lambda i, j, k: (i, j)),
        ),
        compiler_params=pltpu.CompilerParams(
            dimension_semantics=("parallel", "parallel", "arbitrary"),
            vmem_limit_bytes=_VMEM_LIMIT,
        ),
        cost_estimate=cost,
    )(x_p, w_p, b_p)
    if out_dtype != jnp.float32:
        out = out.astype(out_dtype)
    return out[:M, :N]


# ----------------------------------------------------------------------------
# Kernel 2: max over views + inter (LN+Linear+Sigmoid) + both heads, fused.
#           LayerNorm affines pre-folded into the Linear weights (exact fold,
#           done once in f32 outside the kernel); both tiny heads emitted as a
#           single lane-dense (tb, 128) matmul output.
# ----------------------------------------------------------------------------
def _heads_kernel(feats_ref, w_in_ref, b_in_ref, w_hd_ref, b_hd_ref, out_ref):
    feats = feats_ref[...].astype(jnp.float32)          # (tb, V, F)
    pooled = jnp.max(feats, axis=1)                     # (tb, F) max over views

    def normalize(x):                                   # LayerNorm without affine
        mu = jnp.mean(x, axis=-1, keepdims=True)
        c = x - mu
        var = jnp.mean(c * c, axis=-1, keepdims=True)   # two-pass: no cancellation
        return c * jax.lax.rsqrt(var + EPS)

    # inter = Sigmoid(Linear(LayerNorm(pooled)))  (gamma/beta folded into w/b)
    xin = normalize(pooled).astype(jnp.bfloat16)        # bf16 operands on the MXU
    inter = jnp.dot(xin, w_in_ref[...], preferred_element_type=jnp.float32)
    inter = jax.nn.sigmoid(inter + b_in_ref[...])       # exp/recip on the EUP

    # both heads fused: out lanes 0:4 = offence, 4:12 = action, rest zero
    xhd = normalize(inter).astype(jnp.bfloat16)
    out_ref[...] = (
        jnp.dot(xhd, w_hd_ref[...], preferred_element_type=jnp.float32)
        + b_hd_ref[...]
    )


def heads_forward(feats, w_in, b_in, w_hd, b_hd):
    B, V, F = feats.shape
    HN = w_hd.shape[1]                                  # 128 (lane-dense padded)
    tb = min(_round_up(B, 8), 128)                      # >=8 sublanes, unmasked vst
    Bp = _round_up(B, tb)
    feats_p = feats if Bp == B else jnp.pad(feats, ((0, Bp - B), (0, 0), (0, 0)))

    out = pl.pallas_call(
        _heads_kernel,
        out_shape=jax.ShapeDtypeStruct((Bp, HN), jnp.float32),
        grid_spec=pltpu.PrefetchScalarGridSpec(
            num_scalar_prefetch=0,
            grid=(Bp // tb,),
            in_specs=[
                pl.BlockSpec((tb, V, F), lambda i: (i, 0, 0)),
                pl.BlockSpec((F, F), lambda i: (0, 0)),
                pl.BlockSpec((1, F), lambda i: (0, 0)),
                pl.BlockSpec((F, HN), lambda i: (0, 0)),
                pl.BlockSpec((1, HN), lambda i: (0, 0)),
            ],
            out_specs=pl.BlockSpec((tb, HN), lambda i: (i, 0)),
        ),
        compiler_params=pltpu.CompilerParams(
            dimension_semantics=("parallel",),
            vmem_limit_bytes=_VMEM_LIMIT,
        ),
    )(feats_p, w_in, b_in, w_hd, b_hd)
    return out[:B]


# ----------------------------------------------------------------------------
# Forward pass
# ----------------------------------------------------------------------------
def mv_aggregate10_forward(mvimages, params):
    """MVAggregate10 forward (agr_type='max').

    mvimages: (B, V, C, H, W) float32
    returns (pred_offence_severity (B,4), pred_action (B,8), attention (B,V,F))
    """
    B, V, C, H, W = mvimages.shape
    F = params["w_inter"].shape[0]

    # --- stand-in backbone: per-view feature extraction (bf16 GEMM) ----------
    x_flat = mvimages.reshape(B * V, C * H * W)          # f32; cast inside kernel
    feats = backbone_features(x_flat, params["w_backbone"], params["b_backbone"])
    feats = feats.reshape(B, V, F)        # bf16 aux / attention of the aggregator

    # --- fold LayerNorm affines into the following Linear weights (exact, f32) --
    w_in = params["g_inter"].reshape(F, 1) * params["w_inter"]          # (F, F)
    b_in = params["beta_inter"] @ params["w_inter"] + params["b_inter"]  # (1, F)

    w_off = params["g_off"].reshape(F, 1) * params["w_off"]             # (F, 4)
    b_off = params["beta_off"] @ params["w_off"] + params["b_off"]      # (1, 4)
    w_act = params["g_act"].reshape(F, 1) * params["w_act"]             # (F, 8)
    b_act = params["beta_act"] @ params["w_act"] + params["b_act"]      # (1, 8)

    HN = 128                                                   # lane-dense width
    w_hd = jnp.zeros((F, HN), jnp.float32).at[:, 0:4].set(w_off).at[:, 4:12].set(w_act)
    b_hd = jnp.zeros((1, HN), jnp.float32).at[:, 0:4].set(b_off).at[:, 4:12].set(b_act)

    # --- aggregation + inter + heads, fused kernel (bf16 weights) -------------
    heads = heads_forward(feats, w_in.astype(jnp.bfloat16), b_in,
                          w_hd.astype(jnp.bfloat16), b_hd)      # (B, 128)
    pred_offence = heads[:, 0:4]
    pred_action = heads[:, 4:12]

    # ViewMaxAggregate returns the per-view features as `attention` (f32).
    attention = feats.astype(jnp.float32)
    return pred_offence, pred_action, attention


def init_params(key, chw, feat_dim):
    ks = jax.random.split(key, 8)
    sc_bb = 1.0 / jnp.sqrt(jnp.float32(chw))
    sc_f = 1.0 / jnp.sqrt(jnp.float32(feat_dim))
    return dict(
        # stand-in backbone (weights stored bf16 for the MXU)
        w_backbone=(jax.random.normal(ks[0], (chw, feat_dim), jnp.float32)
                    * sc_bb).astype(jnp.bfloat16),
        b_backbone=jnp.zeros((1, feat_dim), jnp.float32),
        # inter: LayerNorm(feat_dim) + Linear(feat_dim, feat_dim) + Sigmoid
        g_inter=jnp.ones((1, feat_dim), jnp.float32),
        beta_inter=jnp.zeros((1, feat_dim), jnp.float32),
        w_inter=jax.random.normal(ks[1], (feat_dim, feat_dim), jnp.float32) * sc_f,
        b_inter=jax.random.normal(ks[2], (1, feat_dim), jnp.float32) * sc_f,
        # fc_offence: LayerNorm(feat_dim) + Linear(feat_dim, 4)
        g_off=jnp.ones((1, feat_dim), jnp.float32),
        beta_off=jnp.zeros((1, feat_dim), jnp.float32),
        w_off=jax.random.normal(ks[3], (feat_dim, 4), jnp.float32) * sc_f,
        b_off=jax.random.normal(ks[4], (1, 4), jnp.float32) * sc_f,
        # fc_action: LayerNorm(feat_dim) + Linear(feat_dim, 8)
        g_act=jnp.ones((1, feat_dim), jnp.float32),
        beta_act=jnp.zeros((1, feat_dim), jnp.float32),
        w_act=jax.random.normal(ks[5], (feat_dim, 8), jnp.float32) * sc_f,
        b_act=jax.random.normal(ks[6], (1, 8), jnp.float32) * sc_f,
    )


# ----------------------------------------------------------------------------
# Pure-JAX reference (f32) for a sanity check against the Pallas path
# ----------------------------------------------------------------------------
def _reference_forward(mvimages, params):
    B, V, C, H, W = mvimages.shape
    x_flat = mvimages.reshape(B * V, C * H * W)
    feats = x_flat @ params["w_backbone"].astype(jnp.float32) + params["b_backbone"]
    feats = feats.reshape(B, V, -1)
    pooled = jnp.max(feats, axis=1)

    def layernorm(x, g, b):
        mu = jnp.mean(x, axis=-1, keepdims=True)
        var = jnp.mean((x - mu) ** 2, axis=-1, keepdims=True)
        return (x - mu) * jax.lax.rsqrt(var + EPS) * g + b

    inter = layernorm(pooled, params["g_inter"], params["beta_inter"])
    inter = inter @ params["w_inter"] + params["b_inter"]
    inter = jax.nn.sigmoid(inter)
    off = layernorm(inter, params["g_off"], params["beta_off"]) @ params["w_off"] + params["b_off"]
    act = layernorm(inter, params["g_act"], params["beta_act"]) @ params["w_act"] + params["b_act"]
    return off, act, feats


if __name__ == "__main__":
    # small shapes: batch=2, views=3, channels=3, spatial=16, feat_dim=128
    B, V, C, H, W = 2, 3, 3, 16, 16
    FEAT_DIM = 128   # multiple of 128 so every matmul/LN row fills full vreg lanes

    key = jax.random.PRNGKey(0)
    k_x, k_p = jax.random.split(key)
    mvimages = jax.random.normal(k_x, (B, V, C, H, W), jnp.float32)
    params = init_params(k_p, C * H * W, FEAT_DIM)

    fwd = jax.jit(mv_aggregate10_forward)
    pred_off, pred_act, attention = fwd(mvimages, params)
    jax.block_until_ready((pred_off, pred_act, attention))

    assert pred_off.shape == (B, 4)
    assert pred_act.shape == (B, 8)
    assert attention.shape == (B, V, FEAT_DIM)

    # loose tolerances: backbone + head matmuls use bf16 operands in the Pallas path
    ref_off, ref_act, ref_attn = _reference_forward(mvimages, params)
    assert jnp.max(jnp.abs(attention - ref_attn)) < 0.1
    assert jnp.max(jnp.abs(pred_off - ref_off)) < 0.15
    assert jnp.max(jnp.abs(pred_act - ref_act)) < 0.15

    print("KERNEL_OK")
</pallas_src>

<mosaic_0001>
module attributes {stable_mosaic.version = 11 : i64} {
  func.func @_backbone_kernel_1k(%arg0: i32, %arg1: i32, %arg2: memref<8x768xf32, #tpu.memory_space<vmem>>, %arg3: memref<768x128xbf16, #tpu.memory_space<vmem>>, %arg4: memref<1x128xf32, #tpu.memory_space<vmem>>, %arg5: memref<8x128xbf16, #tpu.memory_space<vmem>>) attributes {dimension_semantics = [#tpu.dimension_semantics<parallel>, #tpu.dimension_semantics<parallel>], iteration_bounds = array<i64: 1, 1>, scalar_prefetch = 0 : i64, scratch_operands = 0 : i64, tpu.core_type = #tpu.core_type<tc>, window_params = [{transform_indices = @transform_0, window_bounds = array<i64: 8, 768>}, {transform_indices = @transform_1, window_bounds = array<i64: 768, 128>}, {transform_indices = @transform_2, window_bounds = array<i64: 1, 128>}, {transform_indices = @transform_3, window_bounds = array<i64: 8, 128>}]} {
    %c0 = arith.constant 0 : index
    %c0_0 = arith.constant 0 : index
    %0 = vector.load %arg2[%c0, %c0_0] : memref<8x768xf32, #tpu.memory_space<vmem>>, vector<8x768xf32>
    %1 = arith.truncf %0 : vector<8x768xf32> to vector<8x768xbf16>
    %c0_1 = arith.constant 0 : index
    %c0_2 = arith.constant 0 : index
    %2 = vector.load %arg3[%c0_1, %c0_2] : memref<768x128xbf16, #tpu.memory_space<vmem>>, vector<768x128xbf16>
    %cst = arith.constant dense<0.000000e+00> : vector<8x128xf32>
    %3 = tpu.matmul %1, %2, %cst {dimension_numbers = #tpu.dot_dimension_numbers<[1], [0], [0], [1], [0, 0, 1, 1], [], []>} : vector<8x768xbf16>, vector<768x128xbf16>, vector<8x128xf32> -> vector<8x128xf32>
    %c0_3 = arith.constant 0 : index
    %c0_4 = arith.constant 0 : index
    %4 = vector.load %arg4[%c0_3, %c0_4] : memref<1x128xf32, #tpu.memory_space<vmem>>, vector<1x128xf32>
    %5 = vector.broadcast %4 : vector<1x128xf32> to vector<8x128xf32>
    %6 = arith.addf %3, %5 : vector<8x128xf32>
    %7 = arith.truncf %6 : vector<8x128xf32> to vector<8x128xbf16>
    %c0_5 = arith.constant 0 : index
    %c0_6 = arith.constant 0 : index
    %8 = vector.load %arg5[%c0_5, %c0_6] : memref<8x128xbf16, #tpu.memory_space<vmem>>, vector<8x128xbf16>
    tpu.vector_store %arg5[%c0_5, %c0_6], %7 {strides = array<i32>} : memref<8x128xbf16, #tpu.memory_space<vmem>>, vector<8x128xbf16>,
    return
  }
  func.func @transform_0(%arg0: i32, %arg1: i32) -> (i32, i32) {
    %c0_i32 = arith.constant 0 : i32
    %c0_i32_0 = arith.constant 0 : i32
    return %arg0, %c0_i32 : i32, i32
  }
  func.func @transform_1(%arg0: i32, %arg1: i32) -> (i32, i32) {
    %c0_i32 = arith.constant 0 : i32
    %c0_i32_0 = arith.constant 0 : i32
    return %c0_i32, %arg1 : i32, i32
  }
  func.func @transform_2(%arg0: i32, %arg1: i32) -> (i32, i32) {
    %c0_i32 = arith.constant 0 : i32
    %c0_i32_0 = arith.constant 0 : i32
    return %c0_i32, %arg1 : i32, i32
  }
  func.func @transform_3(%arg0: i32, %arg1: i32) -> (i32, i32) {
    %c0_i32 = arith.constant 0 : i32
    return %arg0, %arg1 : i32, i32
  }
}

module attributes {stable_mosaic.version = 11 : i64} {
  func.func @_heads_kernel(%arg0: i32, %arg1: memref<8x3x128xbf16, #tpu.memory_space<vmem>>, %arg2: memref<128x128xbf16, #tpu.memory_space<vmem>>, %arg3: memref<1x128xf32, #tpu.memory_space<vmem>>, %arg4: memref<128x128xbf16, #tpu.memory_space<vmem>>, %arg5: memref<1x128xf32, #tpu.memory_space<vmem>>, %arg6: memref<8x128xf32, #tpu.memory_space<vmem>>) attributes {dimension_semantics = [#tpu.dimension_semantics<parallel>], iteration_bounds = array<i64: 1>, scalar_prefetch = 0 : i64, scratch_operands = 0 : i64, tpu.core_type = #tpu.core_type<tc>, window_params = [{transform_indices = @transform_0, window_bounds = array<i64: 8, 3, 128>}, {pipeline_mode = #tpu.pipeline_mode<synchronous>, transform_indices = @transform_1, window_bounds = array<i64: 128, 128>}, {pipeline_mode = #tpu.pipeline_mode<synchronous>, transform_indices = @transform_2, window_bounds = array<i64: 1, 128>}, {pipeline_mode = #tpu.pipeline_mode<synchronous>, transform_indices = @transform_3, window_bounds = array<i64: 128, 128>}, {pipeline_mode = #tpu.pipeline_mode<synchronous>, transform_indices = @transform_4, window_bounds = array<i64: 1, 128>}, {transform_indices = @transform_5, window_bounds = array<i64: 8, 128>}]} {
    %c0 = arith.constant 0 : index
    %c0_0 = arith.constant 0 : index
    %c0_1 = arith.constant 0 : index
    %0 = vector.load %arg1[%c0, %c0_0, %c0_1] : memref<8x3x128xbf16, #tpu.memory_space<vmem>>, vector<8x3x128xbf16>
    %1 = arith.extf %0 : vector<8x3x128xbf16> to vector<8x3x128xf32>
    %cst = arith.constant dense<0xFF800000> : vector<8x128xf32>
    %2 = vector.multi_reduction <maximumf>, %1, %cst [1] : vector<8x3x128xf32> to vector<8x128xf32>
    %cst_2 = arith.constant dense<0.000000e+00> : vector<8xf32>
    %3 = vector.multi_reduction <add>, %2, %cst_2 [1] : vector<8x128xf32> to vector<8xf32>
    %4 = vector.shape_cast %3 : vector<8xf32> to vector<8x1xf32>
    %cst_3 = arith.constant 1.280000e+02 : f32
    %5 = vector.broadcast %cst_3 : f32 to vector<8x1xf32>
    %6 = arith.divf %4, %5 : vector<8x1xf32>
    %7 = vector.broadcast %6 : vector<8x1xf32> to vector<8x128xf32>
    %8 = arith.subf %2, %7 : vector<8x128xf32>
    %9 = arith.mulf %8, %8 : vector<8x128xf32>
    %cst_4 = arith.constant dense<0.000000e+00> : vector<8xf32>
    %10 = vector.multi_reduction <add>, %9, %cst_4 [1] : vector<8x128xf32> to vector<8xf32>
    %11 = vector.shape_cast %10 : vector<8xf32> to vector<8x1xf32>
    %cst_5 = arith.constant 1.280000e+02 : f32
    %12 = vector.broadcast %cst_5 : f32 to vector<8x1xf32>
    %13 = arith.divf %11, %12 : vector<8x1xf32>
    %cst_6 = arith.constant 9.99999974E-6 : f32
    %14 = vector.broadcast %cst_6 : f32 to vector<8x1xf32>
    %15 = arith.addf %13, %14 : vector<8x1xf32>
    %16 = math.rsqrt %15 : vector<8x1xf32>
    %17 = vector.broadcast %16 : vector<8x1xf32> to vector<8x128xf32>
    %18 = arith.mulf %8, %17 : vector<8x128xf32>
    %19 = arith.truncf %18 : vector<8x128xf32> to vector<8x128xbf16>
    %c0_7 = arith.constant 0 : index
    %c0_8 = arith.constant 0 : index
    %20 = vector.load %arg2[%c0_7, %c0_8] : memref<128x128xbf16, #tpu.memory_space<vmem>>, vector<128x128xbf16>
    %cst_9 = arith.constant dense<0.000000e+00> : vector<8x128xf32>
    %21 = tpu.matmul %19, %20, %cst_9 {dimension_numbers = #tpu.dot_dimension_numbers<[1], [0], [0], [1], [0, 0, 1, 1], [], []>} : vector<8x128xbf16>, vector<128x128xbf16>, vector<8x128xf32> -> vector<8x128xf32>
    %c0_10 = arith.constant 0 : index
    %c0_11 = arith.constant 0 : index
    %22 = vector.load %arg3[%c0_10, %c0_11] : memref<1x128xf32, #tpu.memory_space<vmem>>, vector<1x128xf32>
    %23 = vector.broadcast %22 : vector<1x128xf32> to vector<8x128xf32>
    %24 = arith.addf %21, %23 : vector<8x128xf32>
    %25 = arith.negf %24 : vector<8x128xf32>
    %26 = math.exp %25 : vector<8x128xf32>
    %cst_12 = arith.constant 1.000000e+00 : f32
    %27 = vector.broadcast %cst_12 : f32 to vector<8x128xf32>
    %28 = arith.addf %27, %26 : vector<8x128xf32>
    %29 = arith.divf %27, %28 : vector<8x128xf32>
    %cst_13 = arith.constant dense<0.000000e+00> : vector<8xf32>
    %30 = vector.multi_reduction <add>, %29, %cst_13 [1] : vector<8x128xf32> to vector<8xf32>
    %31 = vector.shape_cast %30 : vector<8xf32> to vector<8x1xf32>
    %cst_14 = arith.constant 1.280000e+02 : f32
    %32 = vector.broadcast %cst_14 : f32 to vector<8x1xf32>
    %33 = arith.divf %31, %32 : vector<8x1xf32>
    %34 = vector.broadcast %33 : vector<8x1xf32> to vector<8x128xf32>
    %35 = arith.subf %29, %34 : vector<8x128xf32>
    %36 = arith.mulf %35, %35 : vector<8x128xf32>
    %cst_15 = arith.constant dense<0.000000e+00> : vector<8xf32>
    %37 = vector.multi_reduction <add>, %36, %cst_15 [1] : vector<8x128xf32> to vector<8xf32>
    %38 = vector.shape_cast %37 : vector<8xf32> to vector<8x1xf32>
    %cst_16 = arith.constant 1.280000e+02 : f32
    %39 = vector.broadcast %cst_16 : f32 to vector<8x1xf32>
    %40 = arith.divf %38, %39 : vector<8x1xf32>
    %cst_17 = arith.constant 9.99999974E-6 : f32
    %41 = vector.broadcast %cst_17 : f32 to vector<8x1xf32>
    %42 = arith.addf %40, %41 : vector<8x1xf32>
    %43 = math.rsqrt %42 : vector<8x1xf32>
    %44 = vector.broadcast %43 : vector<8x1xf32> to vector<8x128xf32>
    %45 = arith.mulf %35, %44 : vector<8x128xf32>
    %46 = arith.truncf %45 : vector<8x128xf32> to vector<8x128xbf16>
    %c0_18 = arith.constant 0 : index
    %c0_19 = arith.constant 0 : index
    %47 = vector.load %arg4[%c0_18, %c0_19] : memref<128x128xbf16, #tpu.memory_space<vmem>>, vector<128x128xbf16>
    %cst_20 = arith.constant dense<0.000000e+00> : vector<8x128xf32>
    %48 = tpu.matmul %46, %47, %cst_20 {dimension_numbers = #tpu.dot_dimension_numbers<[1], [0], [0], [1], [0, 0, 1, 1], [], []>} : vector<8x128xbf16>, vector<128x128xbf16>, vector<8x128xf32> -> vector<8x128xf32>
    %c0_21 = arith.constant 0 : index
    %c0_22 = arith.constant 0 : index
    %49 = vector.load %arg5[%c0_21, %c0_22] : memref<1x128xf32, #tpu.memory_space<vmem>>, vector<1x128xf32>
    %50 = vector.broadcast %49 : vector<1x128xf32> to vector<8x128xf32>
    %51 = arith.addf %48, %50 : vector<8x128xf32>
    %c0_23 = arith.constant 0 : index
    %c0_24 = arith.constant 0 : index
    %52 = vector.load %arg6[%c0_23, %c0_24] : memref<8x128xf32, #tpu.memory_space<vmem>>, vector<8x128xf32>
    tpu.vector_store %arg6[%c0_23, %c0_24], %51 {strides = array<i32>} : memref<8x128xf32, #tpu.memory_space<vmem>>, vector<8x128xf32>,
    return
  }
  func.func @transform_0(%arg0: i32) -> (i32, i32, i32) {
    %c0_i32 = arith.constant 0 : i32
    %c0_i32_0 = arith.constant 0 : i32
    %c0_i32_1 = arith.constant 0 : i32
    return %arg0, %c0_i32, %c0_i32_0 : i32, i32, i32
  }
  func.func @transform_1(%arg0: i32) -> (i32, i32) {
    %c0_i32 = arith.constant 0 : i32
    %c0_i32_0 = arith.constant 0 : i32
    %c0_i32_1 = arith.constant 0 : i32
    return %c0_i32, %c0_i32_0 : i32, i32
  }
  func.func @transform_2(%arg0: i32) -> (i32, i32) {
    %c0_i32 = arith.constant 0 : i32
    %c0_i32_0 = arith.constant 0 : i32
    %c0_i32_1 = arith.constant 0 : i32
    return %c0_i32, %c0_i32_0 : i32, i32
  }
  func.func @transform_3(%arg0: i32) -> (i32, i32) {
    %c0_i32 = arith.constant 0 : i32
    %c0_i32_0 = arith.constant 0 : i32
    %c0_i32_1 = arith.constant 0 : i32
    return %c0_i32, %c0_i32_0 : i32, i32
  }
  func.func @transform_4(%arg0: i32) -> (i32, i32) {
    %c0_i32 = arith.constant 0 : i32
    %c0_i32_0 = arith.constant 0 : i32
    %c0_i32_1 = arith.constant 0 : i32
    return %c0_i32, %c0_i32_0 : i32, i32
  }
  func.func @transform_5(%arg0: i32) -> (i32, i32) {
    %c0_i32 = arith.constant 0 : i32
    %c0_i32_0 = arith.constant 0 : i32
    return %arg0, %c0_i32 : i32, i32
  }
}

</mosaic_0001>

<bundles_post_ra>
// kernel: mv_aggregate10_forward.2
= control target key start
LH: loop header
LB: loop body
LE: loop exit
PB: predicated region body
PF: predicated region fallthrough
CT: control target
= control target key end

     0   :  { %s895_s1 = inlined_call_operand.vmem [shape: bf16[768,128], index: 1, kind: input, shape index: {}]   ;;  %s896_s0 = inlined_call_operand.vmem [shape: f32[8,768], index: 0, kind: input, shape index: {}]   ;;  %s897_s2 = inlined_call_operand.vmem [shape: f32[1,128], index: 2, kind: input, shape index: {}]   ;;  %s898_s3 = inlined_call_operand.vmem [shape: bf16[8,128], index: 3, kind: output, shape index: {}]  }
   0x1   :  { %v659_v0 = vld [vmem:[%s895_s1 + $0x40] sm:$0xff]   ;;  %v663_v4 = vld [vmem:[%s895_s1 + $0x48] sm:$0xff]   ;;  %v667_v8 = vld [vmem:[%s895_s1 + $0x50] sm:$0xff]  }
   0x2   :  { %v660_v1 = vld [vmem:[%s895_s1] sm:$0xff]   ;;  %593 = vmatprep.subr.bf16.mxu0 %v659_v0  ;;  %v664_v5 = vld [vmem:[%s895_s1 + $0x8] sm:$0xff]   ;;  %v668_v9 = vld [vmem:[%s895_s1 + $0x10] sm:$0xff]  }
   0x3   :  { %v661_v2 = vld [vmem:[%s895_s1 + $0xc0] sm:$0xff]   ;;  %594 = vmatpush3.bf16.msra.mxu0 %v660_v1  ;;  %v665_v6 = vld [vmem:[%s895_s1 + $0xc8] sm:$0xff]   ;;  %v669_v10 = vld [vmem:[%s895_s1 + $0xd0] sm:$0xff]  }
   0x4   :  { %v662_v3 = vld [vmem:[%s895_s1 + $0x80] sm:$0xff]   ;;  %615 = vmatprep.subr.bf16.mxu1 %v661_v2  ;;  %595 = vmatprep.subr.bf16.mxu0 %v663_v4  ;;  %v666_v7 = vld [vmem:[%s895_s1 + $0x88] sm:$0xff]   ;;  %v670_v11 = vld [vmem:[%s895_s1 + $0x90] sm:$0xff]  }
   0x5   :  { %616 = vmatpush3.bf16.msra.mxu1 %v662_v3  ;;  %v671_v12 = vld [vmem:[%s895_s1 + $0x58] sm:$0xff]   ;;  %v675_v16 = vld [vmem:[%s895_s1 + $0x60] sm:$0xff]   ;;  %v679_v20 = vld [vmem:[%s895_s1 + $0x68] sm:$0xff]  }
   0x6   :  { %617 = vmatprep.subr.bf16.mxu1 %v665_v6  ;;  %v672_v13 = vld [vmem:[%s895_s1 + $0x18] sm:$0xff]   ;;  %v676_v17 = vld [vmem:[%s895_s1 + $0x20] sm:$0xff]   ;;  %v680_v21 = vld [vmem:[%s895_s1 + $0x28] sm:$0xff]  }
   0x7   :  { %596 = vmatpush3.bf16.msra.mxu0 %v664_v5  ;;  %v673_v14 = vld [vmem:[%s895_s1 + $0xd8] sm:$0xff]   ;;  %v677_v18 = vld [vmem:[%s895_s1 + $0xe0] sm:$0xff]   ;;  %v681_v22 = vld [vmem:[%s895_s1 + $0xe8] sm:$0xff]  }
   0x8   :  { %597 = vmatprep.subr.bf16.mxu0 %v667_v8  ;;  %v674_v15 = vld [vmem:[%s895_s1 + $0x98] sm:$0xff]   ;;  %v678_v19 = vld [vmem:[%s895_s1 + $0xa0] sm:$0xff]   ;;  %v682_v23 = vld [vmem:[%s895_s1 + $0xa8] sm:$0xff]  }
   0x9   :  { %618 = vmatpush3.bf16.msra.mxu1 %v666_v7  ;;  %v683_v24 = vld [vmem:[%s895_s1 + $0x70] sm:$0xff]   ;;  %v687_v28 = vld [vmem:[%s895_s1 + $0x78] sm:$0xff]   ;;  %v16_v31 = vld [vmem:[%s896_s0 + $0x8] sm:$0xff] }
   0xa   :  { %619 = vmatprep.subr.bf16.mxu1 %v669_v10  ;;  %v684_v25 = vld [vmem:[%s895_s1 + $0x30] sm:$0xff]   ;;  %v688_v29 = vld [vmem:[%s895_s1 + $0x38] sm:$0xff]   ;;  %v22_v32 = vpack.c.bf16 %v16_v31, %v16_v31  ;;  %v15_v34 = vld [vmem:[%s896_s0] sm:$0xff] }
   0xb   :  { %598 = vmatpush3.bf16.msra.mxu0 %v668_v9  ;;  %v685_v26 = vld [vmem:[%s895_s1 + $0xf0] sm:$0xff]   ;;  %v689_v30 = vld [vmem:[%s895_s1 + $0xf8] sm:$0xff]   ;;  %v21_v35 = vpack.c.bf16 %v15_v34, %v15_v34  ;;  %v691_v36 = vld [vmem:[%s895_s1 + $0x140] sm:$0xff]  }
   0xc   :  { %599 = vmatprep.subr.bf16.mxu0 %v671_v12  ;;  %v686_v27 = vld [vmem:[%s895_s1 + $0xb0] sm:$0xff]   ;;  %v690_v33 = vld [vmem:[%s895_s1 + $0xb8] sm:$0xff]   ;;  %450 = vmatprep.mubr.bf16.mxu0 %v22_v32  ;;  %v692_v39 = vld [vmem:[%s895_s1 + $0x100] sm:$0xff]  }
   0xd   :  { %620 = vmatpush3.bf16.msra.mxu1 %v670_v11  ;;  %v18_v37 = vld [vmem:[%s896_s0 + $0x18] sm:$0xff]  ;;  %v17_v40 = vld [vmem:[%s896_s0 + $0x10] sm:$0xff]  ;;  %v693_v42 = vld [vmem:[%s895_s1 + $0x148] sm:$0xff]  }
   0xe   :  { %621 = vmatprep.subr.bf16.mxu1 %v673_v14  ;;  %v24_v38 = vpack.c.bf16 %v18_v37, %v18_v37  ;;  %v23_v41 = vpack.c.bf16 %v17_v40, %v17_v40  ;;  %v694_v43 = vld [vmem:[%s895_s1 + $0x108] sm:$0xff]   ;;  %v695_v44 = vld [vmem:[%s895_s1 + $0x150] sm:$0xff]   ;;  %v697_v46 = vld [vmem:[%s895_s1 + $0x158] sm:$0xff]  }
   0xf   :  { %600 = vmatpush3.bf16.msra.mxu0 %v672_v13  ;;  %v696_v45 = vld [vmem:[%s895_s1 + $0x110] sm:$0xff]   ;;  %v698_v47 = vld [vmem:[%s895_s1 + $0x118] sm:$0xff]   ;;  %v699_v48 = vld [vmem:[%s895_s1 + $0x160] sm:$0xff]  }
  0x10   :  { %601 = vmatprep.subr.bf16.mxu0 %v675_v16  ;;  %490 = vmatprep.mubr.bf16.mxu1 %v24_v38  ;;  %v700_v49 = vld [vmem:[%s895_s1 + $0x120] sm:$0xff]   ;;  %v701_v50 = vld [vmem:[%s895_s1 + $0x168] sm:$0xff]   ;;  %v703_v54 = vld [vmem:[%s895_s1 + $0x170] sm:$0xff]  }
  0x11   :  { %622 = vmatpush3.bf16.msra.mxu1 %v674_v15  ;;  %v20_v51 = vld [vmem:[%s896_s0 + $0x28] sm:$0xff]  ;;  %v704_v55 = vld [vmem:[%s895_s1 + $0x130] sm:$0xff]   ;;  %v705_v56 = vld [vmem:[%s895_s1 + $0x178] sm:$0xff]  }
  0x12   :  { %623 = vmatprep.subr.bf16.mxu1 %v677_v18  ;;  %v26_v52 = vpack.c.bf16 %v20_v51, %v20_v51  ;;  %v702_v53 = vld [vmem:[%s895_s1 + $0x128] sm:$0xff]   ;;  %v706_v57 = vld [vmem:[%s895_s1 + $0x138] sm:$0xff]   ;;  %v19_v58 = vld [vmem:[%s896_s0 + $0x20] sm:$0xff] }
  0x13   :  { %602 = vmatpush3.bf16.msra.mxu0 %v676_v17  ;;  %v25_v59 = vpack.c.bf16 %v19_v58, %v19_v58  ;;  %v544_v61 = vld [vmem:[%s897_s2] ss:$0 sm:$0xff] }
  0x14   :  { %603 = vmatprep.subr.bf16.mxu0 %v679_v20 }
  0x15   :  { %624 = vmatpush3.bf16.msra.mxu1 %v678_v19 }
  0x16   :  { %625 = vmatprep.subr.bf16.mxu1 %v681_v22 }
  0x17   :  { %604 = vmatpush3.bf16.msra.mxu0 %v680_v21 }
  0x18   :  { %605 = vmatprep.subr.bf16.mxu0 %v683_v24 }
  0x19   :  { %626 = vmatpush3.bf16.msra.mxu1 %v682_v23 }
  0x1a   :  { %627 = vmatprep.subr.bf16.mxu1 %v685_v26 }
  0x1b   :  { %606 = vmatpush3.bf16.msra.mxu0 %v684_v25 }
  0x1c   :  { %607 = vmatprep.subr.bf16.mxu0 %v687_v28 }
  0x1d   :  { %628 = vmatpush3.bf16.msra.mxu1 %v686_v27 }
  0x1e   :  { %629 = vmatprep.subr.bf16.mxu1 %v689_v30 }
  0x1f   :  { %608 = vmatpush3.bf16.msra.mxu0 %v688_v29 }
  0x20   :  { %637 = vmatprep.subr.bf16.mxu0 %v691_v36 }
  0x21   :  { %630 = vmatpush3.bf16.msra.mxu1 %v690_v33 }
  0x22   :  { %451 = vmatmul.mubr.bf16.vlgmr.msra.gmra.mrb[0].mxu0 %v21_v35 }
  0x23   :  { %638 = vmatpush3.bf16.msra.mxu0 %v692_v39  ;;  %530 = vmatprep.mubr.bf16.mxu0 %v26_v52 }
  0x24   :  { %491 = vmatmul.mubr.bf16.vlgmr.msra.gmra.mrb[0].mxu1 %v23_v41  ;;  %639 = vmatprep.subr.bf16.mxu0 %v693_v42 }
  0x27   :  { %640 = vmatpush3.bf16.msra.mxu0 %v694_v43 }
  0x28   :  { %641 = vmatprep.subr.bf16.mxu0 %v695_v44 }
  0x2b   :  { %642 = vmatpush3.bf16.msra.mxu0 %v696_v45 }
  0x2c   :  { %643 = vmatprep.subr.bf16.mxu0 %v697_v46 }
  0x2f   :  { %644 = vmatpush3.bf16.msra.mxu0 %v698_v47 }
  0x30   :  { %645 = vmatprep.subr.bf16.mxu0 %v699_v48 }
  0x33   :  { %646 = vmatpush3.bf16.msra.mxu0 %v700_v49 }
  0x34   :  { %647 = vmatprep.subr.bf16.mxu0 %v701_v50 }
  0x37   :  { %648 = vmatpush3.bf16.msra.mxu0 %v702_v53 }
  0x38   :  { %649 = vmatprep.subr.bf16.mxu0 %v703_v54 }
  0x3b   :  { %650 = vmatpush3.bf16.msra.mxu0 %v704_v55 }
  0x3c   :  { %651 = vmatprep.subr.bf16.mxu0 %v705_v56 }
  0x3f   :  { %652 = vmatpush3.bf16.msra.mxu0 %v706_v57 }
  0x42   :  { %531 = vmatmul.mubr.bf16.vlgmr.msra.gmra.mrb[4].mxu0 %v25_v59 }
  0xf5   :  { %v609_v60 = vpop.f32.mrb[0].mxu0 }
  0xf6   :  { %v610_v62 = vpop.f32.mrb[1].mxu0 }
  0xf7   :  { %v611_v63 = vadd.f32 %v610_v62, %v609_v60  ;;  %v612_v0 = vpop.f32.mrb[2].mxu0  ;;  %v631_v1 = vpop.f32.mrb[0].mxu1 }
  0xf8   :  { %v613_v2 = vpop.f32.mrb[3].mxu0  ;;  %v632_v4 = vpop.f32.mrb[1].mxu1 }
  0xf9   :  { %v453_v3 = vadd.f32 %v611_v63, %v544_v61  ;;  %v633_v5 = vadd.f32 %v632_v4, %v631_v1  ;;  %v634_v6 = vpop.f32.mrb[2].mxu1 }
  0xfa   :  { %v635_v7 = vpop.f32.mrb[3].mxu1 }
  0xfb   :  { %v493_v8 = vadd.f32 %v633_v5, %v453_v3 }
 0x115   :  { %v653_v9 = vpop.f32.mrb[4].mxu0 }
 0x116   :  { %v654_v10 = vpop.f32.mrb[5].mxu0 }
 0x117   :  { %v655_v11 = vadd.f32 %v654_v10, %v653_v9  ;;  %v656_v12 = vpop.f32.mrb[6].mxu0 }
 0x118   :  { %v657_v13 = vpop.f32.mrb[7].mxu0 }
 0x119   :  { %v533_v14 = vadd.f32 %v655_v11, %v493_v8 }
 0x11b   :  { %v538_v15 = vpack.c.bf16 %v533_v14, %v533_v14 }
 0x11d   :  { %539 = vst [vmem:[%s898_s3] sm:$0xf] %v538_v15 }

// kernel: mv_aggregate10_forward.3
= control target key start
LH: loop header
LB: loop body
LE: loop exit
PB: predicated region body
PF: predicated region fallthrough
CT: control target
= control target key end

     0   :  { %vm37_vm0 = vcmask 1042432   ;;  %vm102_vm1 = vcmask 1041409   ;;  %vm104_vm2 = vcmask 1042434   ;;  %vm106_vm3 = vcmask 1043459   ;;  %s793_s0 = inlined_call_operand.vmem [shape: bf16[8,3,128], index: 0, kind: input, shape index: {}]   ;;  %s794_s1 = inlined_call_operand.vmem [shape: bf16[128,128], index: 1, kind: input, shape index: {}]   ;;  %s795_s2 = inlined_call_operand.vmem [shape: f32[1,128], index: 2, kind: input, shape index: {}]   ;;  %s796_s3 = inlined_call_operand.vmem [shape: bf16[128,128], index: 3, kind: input, shape index: {}]   ;;  %s797_s4 = inlined_call_operand.vmem [shape: f32[1,128], index: 4, kind: input, shape index: {}]   ;;  %s798_s5 = inlined_call_operand.vmem [shape: f32[8,128], index: 5, kind: output, shape index: {}]  }
   0x1   :  { %v21_v0 = vld [vmem:[%s793_s0] sm:$0x3]  ;;  %v22_v1 = vld [vmem:[%s793_s0 + $0x2] sm:$0x3]  ;;  %v23_v2 = vld [vmem:[%s793_s0 + $0x4] sm:$0x3] }
   0x2   :  { %v24_v3 = vld [vmem:[%s793_s0 + $0x6] sm:$0x3]  ;;  %v25_v4 = vld [vmem:[%s793_s0 + $0x8] sm:$0x3]  ;;  %v26_v5 = vld [vmem:[%s793_s0 + $0xa] sm:$0x3]  ;;  %v29_v6 = vunpack.c.l.bf16 %v21_v0  ;;  %v30_v7 = vunpack.c.l.bf16 %v22_v1  ;;  %v31_v8 = vunpack.c.l.bf16 %v23_v2 }
   0x3   :  { %v27_v9 = vld [vmem:[%s793_s0 + $0xc] sm:$0x3]  ;;  %v28_v10 = vld [vmem:[%s793_s0 + $0xe] sm:$0x3]  ;;  %v32_v11 = vunpack.c.l.bf16 %v24_v3  ;;  %v33_v12 = vunpack.c.l.bf16 %v25_v4  ;;  %v34_v13 = vunpack.c.l.bf16 %v26_v5  ;;  %vm108_vm4 = vcmask 1044484  }
   0x4   :  { %v35_v14 = vunpack.c.l.bf16 %v27_v9  ;;  %v36_v15 = vunpack.c.l.bf16 %v28_v10  ;;  %v38_v16 = vsel %vm37_vm0, %v29_v6, -inf  ;;  %v45_v17 = vsel %vm37_vm0, %v30_v7, -inf }
   0x5   :  { %v39_v18 = vrot.slane %v38_v16, 4  ;;  %v46_v19 = vrot.slane %v45_v17, 4  ;;  %v52_v20 = vsel %vm37_vm0, %v31_v8, -inf  ;;  %v59_v21 = vsel %vm37_vm0, %v32_v11, -inf }
   0x6   :  { %v53_v22 = vrot.slane %v52_v20, 4  ;;  %v60_v23 = vrot.slane %v59_v21, 4  ;;  %v66_v24 = vsel %vm37_vm0, %v33_v12, -inf  ;;  %v73_v25 = vsel %vm37_vm0, %v34_v13, -inf }
   0x7   :  { %v40_v26 = vmax.f32 %v38_v16, %v39_v18  ;;  %v47_v27 = vmax.f32 %v45_v17, %v46_v19  ;;  %v67_v28 = vrot.slane %v66_v24, 4  ;;  %v74_v29 = vrot.slane %v73_v25, 4 }
   0x8   :  { %v54_v30 = vmax.f32 %v52_v20, %v53_v22  ;;  %v61_v31 = vmax.f32 %v59_v21, %v60_v23  ;;  %v80_v32 = vsel %vm37_vm0, %v35_v14, -inf  ;;  %v87_v33 = vsel %vm37_vm0, %v36_v15, -inf }
   0x9   :  { %v41_v34 = vrot.slane %v40_v26, 2  ;;  %v48_v35 = vrot.slane %v47_v27, 2  ;;  %v68_v36 = vmax.f32 %v66_v24, %v67_v28  ;;  %v75_v37 = vmax.f32 %v73_v25, %v74_v29 }
   0xa   :  { %v55_v38 = vrot.slane %v54_v30, 2  ;;  %v62_v39 = vrot.slane %v61_v31, 2  ;;  %v81_v40 = vrot.slane %v80_v32, 4  ;;  %v88_v41 = vrot.slane %v87_v33, 4 }
   0xb   :  { %v42_v42 = vmax.f32 %v40_v26, %v41_v34  ;;  %v49_v43 = vmax.f32 %v47_v27, %v48_v35  ;;  %v69_v44 = vrot.slane %v68_v36, 2  ;;  %v76_v45 = vrot.slane %v75_v37, 2 }
   0xc   :  { %v56_v46 = vmax.f32 %v54_v30, %v55_v38  ;;  %v63_v47 = vmax.f32 %v61_v31, %v62_v39  ;;  %v82_v48 = vmax.f32 %v80_v32, %v81_v40  ;;  %v89_v49 = vmax.f32 %v87_v33, %v88_v41 }
   0xd   :  { %v43_v50 = vrot.slane %v42_v42, 1  ;;  %v50_v51 = vrot.slane %v49_v43, 1  ;;  %v70_v52 = vmax.f32 %v68_v36, %v69_v44  ;;  %v77_v53 = vmax.f32 %v75_v37, %v76_v45 }
   0xe   :  { %v57_v54 = vrot.slane %v56_v46, 1  ;;  %v64_v55 = vrot.slane %v63_v47, 1  ;;  %v83_v56 = vrot.slane %v82_v48, 2  ;;  %v90_v57 = vrot.slane %v89_v49, 2 }
   0xf   :  { %v44_v58 = vmax.f32 %v42_v42, %v43_v50  ;;  %v51_v59 = vmax.f32 %v49_v43, %v50_v51  ;;  %v71_v60 = vrot.slane %v70_v52, 1  ;;  %v78_v61 = vrot.slane %v77_v53, 1 }
  0x10   :  { %v58_v62 = vmax.f32 %v56_v46, %v57_v54  ;;  %v65_v63 = vmax.f32 %v63_v47, %v64_v55  ;;  %v84_v0 = vmax.f32 %v82_v48, %v83_v56  ;;  %v91_v1 = vmax.f32 %v89_v49, %v90_v57  ;;  %v569_v54 = vld [vmem:[%s794_s1] sm:$0xff]   ;;  %v570_v56 = vld [vmem:[%s794_s1 + $0x8] sm:$0xff]   ;;  %v571_v57 = vld [vmem:[%s794_s1 + $0x10] sm:$0xff]  }
  0x11   :  { %v72_v2 = vmax.f32 %v70_v52, %v71_v60  ;;  %v79_v3 = vmax.f32 %v77_v53, %v78_v61  ;;  %v103_v4 = vsel %vm102_vm1, %v51_v59, %v44_v58  ;;  %vm110_vm5 = vcmask 1045509   ;;  %v574_v60 = vld [vmem:[%s794_s1 + $0x28] sm:$0xff]   ;;  %v575_v61 = vld [vmem:[%s794_s1 + $0x30] sm:$0xff]  }
  0x12   :  { %v85_v5 = vrot.slane %v84_v0, 1  ;;  %v92_v6 = vrot.slane %v91_v1, 1  ;;  %v105_v7 = vsel %vm104_vm2, %v58_v62, %v103_v4  ;;  %vm112_vm6 = vcmask 1046534  }
  0x13   :  { %v107_v8 = vsel %vm106_vm3, %v65_v63, %v105_v7  ;;  %vm114_vm7 = vcmask 1047559   ;;  %v593_v55 = vmov 0.0   ;;  %vm594_vm8 = vmmov 0  }
  0x14   :  { %v86_v9 = vmax.f32 %v84_v0, %v85_v5  ;;  %v93_v10 = vmax.f32 %v91_v1, %v92_v6  ;;  %v109_v11 = vsel %vm108_vm4, %v72_v2, %v107_v8  ;;  %527 = vmatprep.subr.bf16.mxu0 %v593_v55  ;;  %547 = vmatprep.subr.bf16.mxu1 %v593_v55 }
  0x15   :  { %v111_v12 = vsel %vm110_vm5, %v79_v3, %v109_v11  ;;  %528 = vmatpush3.bf16.msra.mxu0 %v569_v54  ;;  %543 = vmatprep.mubr.msk.bf16.mxu0 %vm594_vm8, %v593_v55 }
  0x16   :  { %v113_v13 = vsel %vm112_vm6, %v86_v9, %v111_v12  ;;  %529 = vmatprep.subr.bf16.mxu0 %v593_v55  ;;  %563 = vmatprep.mubr.msk.bf16.mxu1 %vm594_vm8, %v593_v55 }
  0x17   :  { %v115_v14 = vsel %vm114_vm7, %v93_v10, %v113_v13 }
  0x18   :  { %117 = vadd.xlane.f32.xlu0 %v115_v14 }
  0x19   :  { %530 = vmatpush3.bf16.msra.mxu0 %v570_v56 }
  0x1a   :  { %531 = vmatprep.subr.bf16.mxu0 %v593_v55 }
  0x1d   :  { %532 = vmatpush3.bf16.msra.mxu0 %v571_v57 }
  0x1e   :  { %533 = vmatprep.subr.bf16.mxu0 %v593_v55 }
  0xa5   :  { %v118_v15 = vpop.xlane.xlu0 %117 }
  0xa6   :  { %v120_v16 = vmul.f32 0.0078125, %v118_v15 }
  0xa8   :  { %v122_v17 = vrot.slane %v120_v16, 1  ;;  %v123_v18 = vrot.slane %v120_v16, 2  ;;  %v124_v19 = vrot.slane %v120_v16, 3  ;;  %v125_v20 = vrot.slane %v120_v16, 4 }
  0xa9   :  { %v126_v21 = vrot.slane %v120_v16, 5  ;;  %v127_v22 = vrot.slane %v120_v16, 6  ;;  %v128_v23 = vrot.slane %v120_v16, 7  ;;  %v664_v24 = vsub.f32 %v44_v58, %v120_v16  ;;  %v572_v58 = vld [vmem:[%s794_s1 + $0x18] sm:$0xff]  }
  0xaa   :  { %v666_v25 = vsub.f32 %v51_v59, %v122_v17  ;;  %v668_v26 = vsub.f32 %v58_v62, %v123_v18  ;;  %v670_v27 = vsub.f32 %v65_v63, %v124_v19  ;;  %v672_v28 = vsub.f32 %v72_v2, %v125_v20  ;;  %534 = vmatpush3.bf16.msra.mxu0 %v572_v58  ;;  %v573_v59 = vld [vmem:[%s794_s1 + $0x20] sm:$0xff]   ;;  %v576_v62 = vld [vmem:[%s794_s1 + $0x38] sm:$0xff]  }
  0xab   :  { %v674_v29 = vsub.f32 %v79_v3, %v126_v21  ;;  %v676_v30 = vsub.f32 %v86_v9, %v127_v22  ;;  %v678_v31 = vsub.f32 %v93_v10, %v128_v23  ;;  %v145_v36 = vmul.f32 %v664_v24, %v664_v24  ;;  %535 = vmatprep.subr.bf16.mxu0 %v593_v55 }
  0xac   :  { %v146_v32 = vmul.f32 %v666_v25, %v666_v25  ;;  %v147_v33 = vmul.f32 %v668_v26, %v668_v26  ;;  %v148_v34 = vmul.f32 %v670_v27, %v670_v27  ;;  %v149_v35 = vmul.f32 %v672_v28, %v672_v28 }
  0xad   :  { %v150_v37 = vmul.f32 %v674_v29, %v674_v29  ;;  %v151_v40 = vmul.f32 %v676_v30, %v676_v30  ;;  %v152_v41 = vmul.f32 %v678_v31, %v678_v31 }
  0xae   :  { %v161_v38 = vrot.slane %v146_v32, 7  ;;  %v163_v39 = vrot.slane %v147_v33, 6  ;;  %v165_v43 = vrot.slane %v148_v34, 5  ;;  %v167_v45 = vrot.slane %v149_v35, 4  ;;  %536 = vmatpush3.bf16.msra.mxu0 %v573_v59 }
  0xaf   :  { %v169_v47 = vrot.slane %v150_v37, 3  ;;  %v171_v49 = vrot.slane %v151_v40, 2  ;;  %v173_v51 = vrot.slane %v152_v41, 1  ;;  %537 = vmatprep.subr.bf16.mxu0 %v593_v55 }
  0xb0   :  { %v162_v42 = vsel %vm102_vm1, %v161_v38, %v145_v36 }
  0xb1   :  { %v164_v44 = vsel %vm104_vm2, %v163_v39, %v162_v42 }
  0xb2   :  { %v166_v46 = vsel %vm106_vm3, %v165_v43, %v164_v44  ;;  %538 = vmatpush3.bf16.msra.mxu0 %v574_v60  ;;  %v577_v60 = vld [vmem:[%s796_s3] sm:$0xff]  }
  0xb3   :  { %v168_v48 = vsel %vm108_vm4, %v167_v45, %v166_v46  ;;  %539 = vmatprep.subr.bf16.mxu0 %v593_v55  ;;  %548 = vmatpush3.bf16.msra.mxu1 %v577_v60 }
  0xb4   :  { %v170_v50 = vsel %vm110_vm5, %v169_v47, %v168_v48  ;;  %549 = vmatprep.subr.bf16.mxu1 %v593_v55 }
  0xb5   :  { %v172_v52 = vsel %vm112_vm6, %v171_v49, %v170_v50  ;;  %v490_v49 = vld [vmem:[%s795_s2] ss:$0 sm:$0xff] }
  0xb6   :  { %v174_v53 = vsel %vm114_vm7, %v173_v51, %v172_v52  ;;  %540 = vmatpush3.bf16.msra.mxu0 %v575_v61  ;;  %v578_v61 = vld [vmem:[%s796_s3 + $0x8] sm:$0xff]  }
  0xb7   :  { %176 = vadd.xlane.f32.xlu0 %v174_v53  ;;  %541 = vmatprep.subr.bf16.mxu0 %v593_v55 }
  0xb8   :  { %550 = vmatpush3.bf16.msra.mxu1 %v578_v61 }
  0xb9   :  { %551 = vmatprep.subr.bf16.mxu1 %v593_v55 }
  0xba   :  { %542 = vmatpush3.bf16.msra.mxu0 %v576_v62  ;;  %v579_v62 = vld [vmem:[%s796_s3 + $0x10] sm:$0xff]  }
  0xbc   :  { %552 = vmatpush3.bf16.msra.mxu1 %v579_v62 }
  0xbd   :  { %553 = vmatprep.subr.bf16.mxu1 %v593_v55 }
 0x144   :  { %v177_v63 = vpop.xlane.xlu0 %176 }
 0x145   :  { %v178_v0 = vmul.f32 0.0078125, %v177_v63 }
 0x147   :  { %v179_v1 = vadd.f32 1e-05, %v178_v0 }
 0x149   :  { %585 = vrsqrt.f32 %v179_v1 }
 0x153   :  { %v586_v2 = vpop.eup %585 }
 0x154   :  { %v182_v3 = vrot.slane %v586_v2, 1  ;;  %v183_v4 = vrot.slane %v586_v2, 2  ;;  %v184_v5 = vrot.slane %v586_v2, 3  ;;  %v185_v6 = vrot.slane %v586_v2, 4 }
 0x155   :  { %v186_v7 = vrot.slane %v586_v2, 5  ;;  %v187_v8 = vrot.slane %v586_v2, 6  ;;  %v188_v9 = vrot.slane %v586_v2, 7  ;;  %v197_v10 = vmul.f32 %v586_v2, %v664_v24 }
 0x156   :  { %v198_v11 = vmul.f32 %v182_v3, %v666_v25  ;;  %v199_v12 = vmul.f32 %v183_v4, %v668_v26  ;;  %v200_v13 = vmul.f32 %v184_v5, %v670_v27  ;;  %v201_v14 = vmul.f32 %v185_v6, %v672_v28  ;;  %v580_v3 = vld [vmem:[%s796_s3 + $0x18] sm:$0xff]   ;;  %v581_v4 = vld [vmem:[%s796_s3 + $0x20] sm:$0xff]   ;;  %v582_v5 = vld [vmem:[%s796_s3 + $0x28] sm:$0xff]  }
 0x157   :  { %v202_v15 = vmul.f32 %v186_v7, %v674_v29  ;;  %v203_v16 = vmul.f32 %v187_v8, %v676_v30  ;;  %v204_v17 = vmul.f32 %v188_v9, %v678_v31  ;;  %v205_v18 = vpack.c.bf16 %v197_v10, %v197_v10  ;;  %554 = vmatpush3.bf16.msra.mxu1 %v580_v3  ;;  %v583_v6 = vld [vmem:[%s796_s3 + $0x30] sm:$0xff]   ;;  %v584_v7 = vld [vmem:[%s796_s3 + $0x38] sm:$0xff]  }
 0x158   :  { %v206_v19 = vpack.c.bf16 %v198_v11, %v198_v11  ;;  %v207_v20 = vpack.c.bf16 %v199_v12, %v199_v12  ;;  %v208_v21 = vpack.c.bf16 %v200_v13, %v200_v13  ;;  %v209_v22 = vpack.c.bf16 %v201_v14, %v201_v14  ;;  %555 = vmatprep.subr.bf16.mxu1 %v593_v55  ;;  %v500_v14 = vld [vmem:[%s797_s4] ss:$0 sm:$0xff] }
 0x159   :  { %v210_v23 = vpack.c.bf16 %v202_v15, %v202_v15  ;;  %v211_v24 = vpack.c.bf16 %v203_v16, %v203_v16  ;;  %v212_v25 = vpack.c.bf16 %v204_v17, %v204_v17  ;;  %v244_v34 = vunpack.c.l.b16 %v205_v18 }
 0x15a   :  { %v245_v32 = vunpack.c.l.b16 %v206_v19  ;;  %v246_v26 = vunpack.c.l.b16 %v207_v20  ;;  %v247_v33 = vunpack.c.l.b16 %v208_v21  ;;  %v248_v27 = vunpack.c.l.b16 %v209_v22 }
 0x15b   :  { %v249_v28 = vunpack.c.l.b16 %v210_v23  ;;  %v250_v36 = vunpack.c.l.b16 %v211_v24  ;;  %v251_v30 = vunpack.c.l.b16 %v212_v25  ;;  %556 = vmatpush3.bf16.msra.mxu1 %v581_v4 }
 0x15c   :  { %v252_v35 = vrot.slane %v245_v32, 7  ;;  %v254_v29 = vrot.slane %v246_v26, 6  ;;  %v256_v37 = vrot.slane %v247_v33, 5  ;;  %v258_v39 = vrot.slane %v248_v27, 4  ;;  %557 = vmatprep.subr.bf16.mxu1 %v593_v55 }
 0x15d   :  { %v260_v41 = vrot.slane %v249_v28, 3  ;;  %v262_v43 = vrot.slane %v250_v36, 2  ;;  %v264_v45 = vrot.slane %v251_v30, 1 }
 0x15e   :  { %v253_v31 = vsel %vm102_vm1, %v252_v35, %v244_v34 }
 0x15f   :  { %v255_v38 = vsel %vm104_vm2, %v254_v29, %v253_v31  ;;  %558 = vmatpush3.bf16.msra.mxu1 %v582_v5 }
 0x160   :  { %v257_v40 = vsel %vm106_vm3, %v256_v37, %v255_v38  ;;  %559 = vmatprep.subr.bf16.mxu1 %v593_v55 }
 0x161   :  { %v259_v42 = vsel %vm108_vm4, %v258_v39, %v257_v40 }
 0x162   :  { %v261_v44 = vsel %vm110_vm5, %v260_v41, %v259_v42 }
 0x163   :  { %v263_v46 = vsel %vm112_vm6, %v262_v43, %v261_v44  ;;  %560 = vmatpush3.bf16.msra.mxu1 %v583_v6 }
 0x164   :  { %v265_v47 = vsel %vm114_vm7, %v264_v45, %v263_v46  ;;  %561 = vmatprep.subr.bf16.mxu1 %v593_v55 }
 0x165   :  { %v266_v48 = vpack.c.b16 %v265_v47, %v265_v47 }
 0x167   :  { %544 = vmatmul.mubr.bf16.vlgmr.msra.gmra.mrb[0].mxu0 %v266_v48  ;;  %562 = vmatpush3.bf16.msra.mxu1 %v584_v7 }
 0x23a   :  { %v350_v50 = vpop.f32.mrb[0].mxu0 }
 0x23b   :  { %v351_v51 = vadd.f32 %v490_v49, %v350_v50  ;;  %v545_v52 = vpop.f32.mrb[1].mxu0 }
 0x23c   :  { %v353_v53 = vpop.f32.mrb[2].mxu0 }
 0x23d   :  { %v499_v54 = vmul.f32 -1.442695, %v351_v51  ;;  %v546_v56 = vpop.f32.mrb[3].mxu0 }
 0x23f   :  { %587 = vpow2.f32 %v499_v54 }
 0x249   :  { %v588_v57 = vpop.eup %587 }
 0x24a   :  { %v359_v58 = vadd.f32 1.0, %v588_v57 }
 0x24c   :  { %589 = vrcp.f32 %v359_v58 }
 0x256   :  { %v590_v59 = vpop.eup %589 }
 0x257   :  { %362 = vadd.xlane.f32.xlu1 %v590_v59 }
 0x2e4   :  { %v363_v63 = vpop.xlane.xlu1 %362 }
 0x2e5   :  { %v364_v0 = vmul.f32 0.0078125, %v363_v63 }
 0x2e7   :  { %v365_v1 = vsub.f32 %v590_v59, %v364_v0 }
 0x2e9   :  { %v366_v2 = vmul.f32 %v365_v1, %v365_v1 }
 0x2eb   :  { %367 = vadd.xlane.f32.xlu1 %v366_v2 }
 0x378   :  { %v368_v8 = vpop.xlane.xlu1 %367 }
 0x379   :  { %v369_v9 = vmul.f32 0.0078125, %v368_v8 }
 0x37b   :  { %v370_v10 = vadd.f32 1e-05, %v369_v9 }
 0x37d   :  { %591 = vrsqrt.f32 %v370_v10 }
 0x387   :  { %v592_v11 = vpop.eup %591 }
 0x388   :  { %v372_v12 = vmul.f32 %v592_v11, %v365_v1 }
 0x38a   :  { %v373_v13 = vpack.c.bf16 %v372_v12, %v372_v12 }
 0x38c   :  { %564 = vmatmul.mubr.bf16.vlgmr.msra.gmra.mrb[0].mxu1 %v373_v13 }
 0x45f   :  { %v479_v15 = vpop.f32.mrb[0].mxu1 }
 0x460   :  { %v480_v16 = vadd.f32 %v500_v14, %v479_v15  ;;  %v565_v17 = vpop.f32.mrb[1].mxu1 }
 0x461   :  { %v482_v18 = vpop.f32.mrb[2].mxu1 }
 0x462   :  { %485 = vst [vmem:[%s798_s5] sm:$0xff] %v480_v16  ;;  %v566_v55 = vpop.f32.mrb[3].mxu1 }

</bundles_post_ra>
